<compile_context>
chip_gen: v5e
topology: v5e:2x2
jax: 0.10.0
libtpu: 0.0.40
codegen_flags: <defaults>
</compile_context>

<pallas_src>
import functools
import math

import numpy as np
import jax
import jax.numpy as jnp
from jax import lax
from jax.experimental import pallas as pl
from jax.experimental.pallas import tpu as pltpu

_GOLDEN = 0x9E3779B9
_FMIX_1 = 0x85EBCA6B
_FMIX_2 = 0xC2B2AE35


def _dropout_kernel(*refs, mode, tP, tR, C, mask_stride, thresh, inv_keep):
    """One (tP, tR, C) tile of y = mask * x / keep_prob.

    Keep bit for mask element i: fmix32(i ^ seed*GOLDEN) < thresh.  Tiles that
    share a broadcast-dim coordinate use the same i, so the mask is shared along
    the broadcast axis by construction.
    """
    if mode == "bcast_lanes":
        seed_ref, qpat_ref, x_ref, o_ref = refs
    else:
        seed_ref, x_ref, o_ref = refs

    seed = seed_ref[0].astype(jnp.uint32) * jnp.uint32(_GOLDEN)

    if mode == "elem":
        # Per-element mask: flat index over the (R, C) view.
        base = pl.program_id(1) * (tR * mask_stride)        # scalar unit
        row = lax.broadcasted_iota(jnp.int32, (1, tR, C), 1)
        col = lax.broadcasted_iota(jnp.int32, (1, tR, C), 2)
        idx = base + row * mask_stride + col
    elif mode == "bcast_rows":
        # One mask row per leading (P) slab, shared across the tR broadcast rows.
        base = pl.program_id(0) * (tP * mask_stride)
        p_loc = lax.broadcasted_iota(jnp.int32, (tP, 1, C), 0)
        col = lax.broadcasted_iota(jnp.int32, (tP, 1, C), 2)
        idx = base + p_loc * mask_stride + col
    else:  # "bcast_lanes": lane-axis mask pattern precomputed host-side (qpat).
        base = pl.program_id(1) * (tR * mask_stride)
        row = lax.broadcasted_iota(jnp.int32, (1, tR, C), 1)
        idx = base + row * mask_stride + qpat_ref[...]

    # murmur3-style finalizer: a handful of VPU int ops, hidden under the DMA.
    h = idx.astype(jnp.uint32) ^ seed
    h = h ^ (h >> 16)
    h = h * jnp.uint32(_FMIX_1)
    h = h ^ (h >> 13)
    h = h * jnp.uint32(_FMIX_2)
    h = h ^ (h >> 16)
    keep = h < jnp.uint32(thresh)                 # Bernoulli(keep_prob)

    # Scale in f32 (parity with torch), single cast at the store.
    xf = x_ref[...].astype(jnp.float32)
    y = jnp.where(keep, xf * jnp.float32(inv_keep), jnp.float32(0.0))
    o_ref[...] = y.astype(o_ref.dtype)


def _choose_tiles(P, R, C, itemsize, total_bytes):
    """~8 MiB blocks, >=~4 blocks for big arrays, rows a multiple of 8 (ragged edge OK)."""
    target = int(min(8 << 20, max(512 << 10, total_bytes // 4)))
    row_bytes = max(1, C * itemsize)
    slab_bytes = max(1, R * row_bytes)
    if slab_bytes <= target:
        tR = R
        tP = max(1, min(P, target // slab_bytes))
    else:
        tR = (target // row_bytes) // 8 * 8
        tR = min(R, max(8, tR))
        tP = 1
    return tP, tR


def dropout(x, seed, *, broadcast_dim=None, p_drop=0.15, training=True, donate=False):
    """Pallas-backed equivalent of rf2aa Dropout.forward."""
    if not training or p_drop <= 0.0:
        return x

    shape = tuple(x.shape)
    ndim = x.ndim
    size = math.prod(shape)
    if size == 0:
        return x

    keep_prob = 1.0 - float(p_drop)
    thresh = min(int(round(keep_prob * 2.0 ** 32)), 2 ** 32 - 1)
    inv_keep = 1.0 / keep_prob
    itemsize = jnp.dtype(x.dtype).itemsize

    # ---- choose a lane-dense 3-D view (P, R, C) of x and a mask mode ----
    qpat = None
    if broadcast_dim is None:
        mode = "elem"
        C, i = 1, ndim - 1
        while i >= 0 and C < 128:                 # fold trailing dims until lane-dense
            C *= shape[i]
            i -= 1
        C = max(C, 1)
        P, R = 1, size // C
        mask_stride = C                           # idx = row * C + lane
    else:
        d = broadcast_dim % ndim
        Pd = math.prod(shape[:d]) if d else 1
        Bd = shape[d]
        Qd = math.prod(shape[d + 1:]) if d + 1 < ndim else 1
        if Qd >= 128:
            mode = "bcast_rows"                   # broadcast axis -> sublane rows
            P, R, C = Pd, Bd, Qd
            mask_stride = Qd                      # idx = p_global * Qd + lane
        else:
            mode = "bcast_lanes"                  # fold (Bd, Qd) [+ g leading rows] into lanes
            bq = Bd * Qd
            g = 1
            if bq < 128 and Pd > 1:
                want = -(-128 // bq)              # ceil(128 / bq)
                for cand in range(want, min(Pd, 8 * want) + 1):
                    if Pd % cand == 0:
                        g = cand
                        break
            P, R, C = 1, Pd // g, g * bq
            mask_stride = g * Qd                  # idx = row * (g*Qd) + qpat[lane]
            lane = np.arange(C, dtype=np.int64)
            qpat_np = (lane // bq) * Qd + (lane % Qd)
            qpat = jnp.asarray(qpat_np.reshape(1, 1, C), dtype=jnp.int32)

    x3 = x.reshape(P, R, C)
    total_bytes = size * itemsize
    tP, tR = _choose_tiles(P, R, C, itemsize, total_bytes)
    grid = (pl.cdiv(P, tP), pl.cdiv(R, tR))

    block_bytes = tP * tR * C * itemsize
    # Input + output tiles are double-buffered -> ~4x block bytes live in VMEM.
    vmem_limit = int(min(max(48 << 20, 4 * block_bytes + (4 << 20)), 112 << 20))

    seed_arr = jnp.atleast_1d(jnp.asarray(seed, dtype=jnp.int32))
    kern = functools.partial(
        _dropout_kernel, mode=mode, tP=tP, tR=tR, C=C,
        mask_stride=mask_stride, thresh=thresh, inv_keep=inv_keep)

    tile_spec = pl.BlockSpec((tP, tR, C), lambda p, r: (p, r, 0))
    in_specs = [pl.BlockSpec(memory_space=pltpu.MemorySpace.SMEM)]   # seed scalar
    inputs = [seed_arr]
    if mode == "bcast_lanes":
        in_specs.append(pl.BlockSpec((1, 1, C), lambda p, r: (0, 0, 0)))
        inputs.append(qpat)
    in_specs.append(tile_spec)
    inputs.append(x3)

    alias = {len(inputs) - 1: 0} if donate else {}

    y3 = pl.pallas_call(
        kern,
        out_shape=jax.ShapeDtypeStruct((P, R, C), x.dtype),
        grid=grid,
        in_specs=in_specs,
        out_specs=tile_spec,
        input_output_aliases=alias,
        compiler_params=pltpu.CompilerParams(
            dimension_semantics=("parallel", "parallel"),
            vmem_limit_bytes=vmem_limit),
    )(*inputs)

    return y3.reshape(shape)


if __name__ == "__main__":
    key = jax.random.PRNGKey(0)
    B, L, D = 2, 8, 32
    x = jax.random.normal(key, (B, L, L, D), dtype=jnp.float32)
    p_drop = 0.15
    kp = 1.0 - p_drop

    # 1) broadcast_dim=1 (pair-feature row dropout) -> "bcast_rows" path
    y = jax.block_until_ready(dropout(x, seed=1234, broadcast_dim=1, p_drop=p_drop))
    keep = (y != 0.0)
    assert bool(jnp.allclose(jnp.where(keep, y, 0.0), jnp.where(keep, x / kp, 0.0),
                             rtol=1e-5, atol=1e-6)), "kept values mismatch (bcast_rows)"
    assert bool(jnp.all(keep == keep[:, :1])), "mask not shared along dim 1"
    rate = float(jnp.mean(keep[:, 0].astype(jnp.float32)))
    assert 0.70 < rate < 0.95, f"implausible keep rate {rate}"

    # 2) broadcast_dim=-1 (mask shared along last dim) -> "bcast_lanes" path
    y2 = jax.block_until_ready(dropout(x, seed=7, broadcast_dim=-1, p_drop=p_drop))
    keep2 = (y2 != 0.0)
    assert bool(jnp.allclose(jnp.where(keep2, y2, 0.0), jnp.where(keep2, x / kp, 0.0),
                             rtol=1e-5, atol=1e-6)), "kept values mismatch (bcast_lanes)"
    assert bool(jnp.all(keep2 == keep2[..., :1])), "mask not shared along last dim"
    rate2 = float(jnp.mean(keep2[..., 0].astype(jnp.float32)))
    assert 0.70 < rate2 < 0.97, f"implausible keep rate {rate2}"

    # 3) broadcast_dim=None (full per-element mask) -> "elem" path
    y3 = jax.block_until_ready(dropout(x, seed=99, broadcast_dim=None, p_drop=p_drop))
    keep3 = (y3 != 0.0)
    assert bool(jnp.allclose(jnp.where(keep3, y3, 0.0), jnp.where(keep3, x / kp, 0.0),
                             rtol=1e-5, atol=1e-6)), "kept values mismatch (elem)"
    rate3 = float(jnp.mean(keep3.astype(jnp.float32)))
    assert 0.78 < rate3 < 0.92, f"implausible keep rate {rate3}"

    # 4) bf16 input: scale applied in f32, cast once at the store
    xb = x.astype(jnp.bfloat16)
    yb = jax.block_until_ready(dropout(xb, seed=1234, broadcast_dim=1, p_drop=p_drop))
    keepb = (yb != 0)
    ref_b = (xb.astype(jnp.float32) * jnp.float32(1.0 / kp)).astype(jnp.bfloat16)
    assert bool(jnp.allclose(jnp.where(keepb, yb, 0).astype(jnp.float32),
                             jnp.where(keepb, ref_b, 0).astype(jnp.float32),
                             rtol=2e-2, atol=1e-3)), "bf16 kept values mismatch"
    assert bool(jnp.all(keepb == keepb[:, :1])), "bf16 mask not shared along dim 1"

    # 5) eval mode is identity
    y_eval = dropout(x, seed=1234, broadcast_dim=1, p_drop=p_drop, training=False)
    assert bool(jnp.allclose(y_eval, x))

    print("KERNEL_OK")
</pallas_src>

<mosaic_0001>
module attributes {stable_mosaic.version = 11 : i64} {
  func.func @_dropout_kernel(%arg0: i32, %arg1: i32, %arg2: memref<1xi32, #tpu.memory_space<smem>>, %arg3: memref<2x8x256xf32, #tpu.memory_space<vmem>>, %arg4: memref<2x8x256xf32, #tpu.memory_space<vmem>>) attributes {dimension_semantics = [#tpu.dimension_semantics<parallel>, #tpu.dimension_semantics<parallel>], iteration_bounds = array<i64: 1, 1>, scalar_prefetch = 0 : i64, scratch_operands = 0 : i64, tpu.core_type = #tpu.core_type<tc>, window_params = [{transform_indices = @transform_0, window_bounds = array<i64: 1>}, {transform_indices = @transform_1, window_bounds = array<i64: 2, 8, 256>}, {transform_indices = @transform_2, window_bounds = array<i64: 2, 8, 256>}]} {
    %c0 = arith.constant 0 : index
    %0 = memref.load %arg2[%c0] : memref<1xi32, #tpu.memory_space<smem>>
    %c-1640531527_i32 = arith.constant -1640531527 : i32
    %1 = arith.muli %0, %c-1640531527_i32 : i32
    %c512_i32 = arith.constant 512 : i32
    %2 = arith.muli %arg0, %c512_i32 : i32
    %3 = tpu.iota {dimensions = array<i32: 0>} : vector<2x1x256xi32>
    %4 = tpu.iota {dimensions = array<i32: 2>} : vector<2x1x256xi32>
    %c256_i32 = arith.constant 256 : i32
    %5 = vector.broadcast %c256_i32 : i32 to vector<2x1x256xi32>
    %6 = arith.muli %3, %5 : vector<2x1x256xi32>
    %7 = vector.broadcast %2 : i32 to vector<2x1x256xi32>
    %8 = arith.addi %7, %6 : vector<2x1x256xi32>
    %9 = arith.addi %8, %4 : vector<2x1x256xi32>
    %10 = vector.broadcast %1 : i32 to vector<2x1x256xi32>
    %11 = arith.xori %9, %10 : vector<2x1x256xi32>
    %c16_i32 = arith.constant 16 : i32
    %12 = vector.broadcast %c16_i32 : i32 to vector<2x1x256xi32>
    %13 = arith.shrui %11, %12 : vector<2x1x256xi32>
    %14 = arith.xori %11, %13 : vector<2x1x256xi32>
    %c-2048144789_i32 = arith.constant -2048144789 : i32
    %15 = vector.broadcast %c-2048144789_i32 : i32 to vector<2x1x256xi32>
    %16 = arith.muli %14, %15 : vector<2x1x256xi32>
    %c13_i32 = arith.constant 13 : i32
    %17 = vector.broadcast %c13_i32 : i32 to vector<2x1x256xi32>
    %18 = arith.shrui %16, %17 : vector<2x1x256xi32>
    %19 = arith.xori %16, %18 : vector<2x1x256xi32>
    %c-1028477387_i32 = arith.constant -1028477387 : i32
    %20 = vector.broadcast %c-1028477387_i32 : i32 to vector<2x1x256xi32>
    %21 = arith.muli %19, %20 : vector<2x1x256xi32>
    %c16_i32_0 = arith.constant 16 : i32
    %22 = vector.broadcast %c16_i32_0 : i32 to vector<2x1x256xi32>
    %23 = arith.shrui %21, %22 : vector<2x1x256xi32>
    %24 = arith.xori %21, %23 : vector<2x1x256xi32>
    %c-644245094_i32 = arith.constant -644245094 : i32
    %25 = vector.broadcast %c-644245094_i32 : i32 to vector<2x1x256xi32>
    %26 = arith.cmpi ult, %24, %25 : vector<2x1x256xi32>
    %c0_1 = arith.constant 0 : index
    %c0_2 = arith.constant 0 : index
    %c0_3 = arith.constant 0 : index
    %27 = vector.load %arg3[%c0_1, %c0_2, %c0_3] : memref<2x8x256xf32, #tpu.memory_space<vmem>>, vector<2x8x256xf32>
    %cst = arith.constant 1.17647064 : f32
    %28 = vector.broadcast %cst : f32 to vector<2x8x256xf32>
    %29 = arith.mulf %27, %28 : vector<2x8x256xf32>
    %cst_4 = arith.constant 0.000000e+00 : f32
    %30 = vector.shape_cast %26 : vector<2x1x256xi1> to vector<2x1x256xi1>
    %31 = vector.broadcast %30 : vector<2x1x256xi1> to vector<2x8x256xi1>
    %32 = vector.broadcast %cst_4 : f32 to vector<2x8x256xf32>
    %33 = arith.select %31, %29, %32 : vector<2x8x256xi1>, vector<2x8x256xf32>
    %c0_5 = arith.constant 0 : index
    %c0_6 = arith.constant 0 : index
    %c0_7 = arith.constant 0 : index
    %34 = vector.load %arg4[%c0_5, %c0_6, %c0_7] : memref<2x8x256xf32, #tpu.memory_space<vmem>>, vector<2x8x256xf32>
    tpu.vector_store %arg4[%c0_5, %c0_6, %c0_7], %33 {strides = array<i32>} : memref<2x8x256xf32, #tpu.memory_space<vmem>>, vector<2x8x256xf32>,
    return
  }
  func.func @transform_0(%arg0: i32, %arg1: i32) -> i32 {
    %c0_i32 = arith.constant 0 : i32
    %c0_i32_0 = arith.constant 0 : i32
    return %c0_i32 : i32
  }
  func.func @transform_1(%arg0: i32, %arg1: i32) -> (i32, i32, i32) {
    %c0_i32 = arith.constant 0 : i32
    %c0_i32_0 = arith.constant 0 : i32
    return %arg0, %arg1, %c0_i32 : i32, i32, i32
  }
  func.func @transform_2(%arg0: i32, %arg1: i32) -> (i32, i32, i32) {
    %c0_i32 = arith.constant 0 : i32
    %c0_i32_0 = arith.constant 0 : i32
    return %arg0, %arg1, %c0_i32 : i32, i32, i32
  }
}

</mosaic_0001>

<bundles_post_ra>
// kernel: tpu_custom_call.1
= control target key start
LH: loop header
LB: loop body
LE: loop exit
PB: predicated region body
PF: predicated region fallthrough
CT: control target
= control target key end

     0   :  { %8 = vsyncpa [#allocation4], 0  ;;  %s227_s0 = inlined_call_operand.<no memory space> [shape: s32[1], index: 0, kind: input, shape index: {}]   ;;  %s228_s1 = inlined_call_operand.hbm [shape: f32[2,8,256], index: 1, kind: input, shape index: {}]   ;;  %s229_s2 = inlined_call_operand.hbm [shape: f32[2,8,256], index: 2, kind: output, shape index: {}]  }
   0x1   :  { %9 = vsyncpa [#allocation5], 0  ;;  %s16_s11 = sshll.u32 %s228_s1, 4  ;;  %s193_s12 = smov [#allocation3]   ;;  %s17_s11 = int_to_ptr.hbm [resolvable:$true] %s16_s11 }
   0x2   :  { %s18_s13 = sshll.u32 %s193_s12, 4  ;;  %s194_s14 = smov 256   ;;  %s19_s13 = int_to_ptr.vmem [resolvable:$true] %s18_s13 }
   0x3   :  { %s195_s15 = smov 16  }
   0x4   :  { %24 = dma.hbm_to_vmem [thread:$0]  %s17_s11, 512, %s19_s13, [#allocation4], %s194_s14, %s194_s14, %s195_s15  }
   0x5   :  { %189 = dma.done.wait [#allocation4], 512  }
   0x6   :  { %190 = vsyncadd [#allocation4], 4294966784  ;;  %s30_s18 = smul.u32 2654435769, %s227_s0  ;;  %v32_v0 = vlaneseq  ;;  %v90_v31 = vld [vmem:[#allocation3] sm:$0xff]  ;;  %v91_v37 = vld [vmem:[#allocation3 + $0x8] sm:$0xff] }
   0x7   :  { %v94_v38 = vmul.f32 1.1764706, %v90_v31  ;;  %v92_v40 = vld [vmem:[#allocation3 + $0x10] sm:$0xff]  ;;  %v95_v44 = vmul.f32 1.1764706, %v91_v37  ;;  %v93_v47 = vld [vmem:[#allocation3 + $0x18] sm:$0xff] }
   0x8   :  { %v33_v1 = vand.u32 127, %v32_v0  ;;  %v41_v2 = vstv %s30_s18  ;;  %v96_v49 = vmul.f32 1.1764706, %v92_v40  ;;  %s196_s0 = smov [#allocation6]   ;;  %v97_v53 = vmul.f32 1.1764706, %v93_v47 }
   0x9   :  { %s118_s1 = sshll.u32 %s196_s0, 4  ;;  %s120_s21 = sshll.u32 %s229_s2, 4  ;;  %s119_s1 = int_to_ptr.vmem [resolvable:$true] %s118_s1  ;;  %s121_s21 = int_to_ptr.hbm [resolvable:$true] %s120_s21 }
   0xa   :  { %v42_v3 = vxor.u32 %v41_v2, %v33_v1  ;;  %v34_v4 = vadd.s32 128, %v33_v1  ;;  %v39_v5 = vadd.s32 256, %v33_v1 }
   0xc   :  { %v46_v6 = vshrl.u32 %v42_v3, 16  ;;  %v43_v7 = vxor.u32 %v41_v2, %v34_v4  ;;  %v44_v8 = vxor.u32 %v41_v2, %v39_v5  ;;  %v40_v9 = vadd.s32 256, %v34_v4 }
   0xe   :  { %v50_v10 = vxor.u32 %v46_v6, %v42_v3  ;;  %v47_v11 = vshrl.u32 %v43_v7, 16  ;;  %v48_v12 = vshrl.u32 %v44_v8, 16  ;;  %v45_v13 = vxor.u32 %v41_v2, %v40_v9 }
  0x10   :  { %v54_v14 = vmul.u32 2246822507, %v50_v10  ;;  %v51_v15 = vxor.u32 %v47_v11, %v43_v7  ;;  %v52_v16 = vxor.u32 %v48_v12, %v44_v8  ;;  %v49_v17 = vshrl.u32 %v45_v13, 16 }
  0x12   :  { %v58_v18 = vshrl.u32 %v54_v14, 13  ;;  %v55_v19 = vmul.u32 2246822507, %v51_v15  ;;  %v56_v20 = vmul.u32 2246822507, %v52_v16  ;;  %v53_v21 = vxor.u32 %v49_v17, %v45_v13 }
  0x14   :  { %v62_v22 = vxor.u32 %v58_v18, %v54_v14  ;;  %v59_v23 = vshrl.u32 %v55_v19, 13  ;;  %v60_v24 = vshrl.u32 %v56_v20, 13  ;;  %v57_v25 = vmul.u32 2246822507, %v53_v21 }
  0x16   :  { %v66_v26 = vmul.u32 3266489909, %v62_v22  ;;  %v63_v27 = vxor.u32 %v59_v23, %v55_v19  ;;  %v64_v28 = vxor.u32 %v60_v24, %v56_v20  ;;  %v61_v29 = vshrl.u32 %v57_v25, 13 }
  0x18   :  { %v70_v30 = vshrl.u32 %v66_v26, 16  ;;  %v67_v32 = vmul.u32 3266489909, %v63_v27  ;;  %v68_v33 = vmul.u32 3266489909, %v64_v28  ;;  %v65_v34 = vxor.u32 %v61_v29, %v57_v25 }
  0x1a   :  { %v74_v35 = vxor.u32 %v70_v30, %v66_v26  ;;  %v71_v36 = vshrl.u32 %v67_v32, 16  ;;  %v72_v39 = vshrl.u32 %v68_v33, 16  ;;  %v69_v41 = vmul.u32 3266489909, %v65_v34 }
  0x1c   :  { %v133_v42 = vxor.u32 2147483648, %v74_v35  ;;  %v75_v43 = vxor.u32 %v71_v36, %v67_v32  ;;  %v76_v45 = vxor.u32 %v72_v39, %v68_v33  ;;  %v73_v46 = vshrl.u32 %v69_v41, 16 }
  0x1e   :  { %vm80_vm0 = vcmp.lt.s32.totalorder %v133_v42, 1503238554  ;;  %v134_v48 = vxor.u32 2147483648, %v75_v43  ;;  %v135_v51 = vxor.u32 2147483648, %v76_v45  ;;  %v77_v52 = vxor.u32 %v73_v46, %v69_v41 }
  0x1f   :  { %v106_v50 = vsel %vm80_vm0, %v94_v38, 0.0 }
  0x20   :  { %110 = vst [vmem:[#allocation6] sm:$0xff] %v106_v50  ;;  %vm83_vm1 = vcmp.lt.s32.totalorder %v134_v48, 1503238554  ;;  %vm86_vm2 = vcmp.lt.s32.totalorder %v135_v51, 1503238554  ;;  %v136_v55 = vxor.u32 2147483648, %v77_v52 }
  0x21   :  { %v107_v54 = vsel %vm83_vm1, %v95_v44, 0.0  ;;  %v108_v56 = vsel %vm86_vm2, %v96_v49, 0.0 }
  0x22   :  { %111 = vst [vmem:[#allocation6 + $0x8] sm:$0xff] %v107_v54  ;;  %vm89_vm3 = vcmp.lt.s32.totalorder %v136_v55, 1503238554 }
  0x23   :  { %112 = vst [vmem:[#allocation6 + $0x10] sm:$0xff] %v108_v56  ;;  %v109_v57 = vsel %vm89_vm3, %v97_v53, 0.0 }
  0x24   :  { %113 = vst [vmem:[#allocation6 + $0x18] sm:$0xff] %v109_v57 }
  0x25   :  { %126 = dma.vmem_to_hbm [thread:$0]  %s119_s1, 512, %s121_s21, [#allocation5], %s194_s14, %s194_s14, %s195_s15  }
  0x26   :  { %191 = dma.done.wait [#allocation5], 512  }
  0x27   :  { %192 = vsyncadd [#allocation5], 4294966784 }
  0x28   :  { %131 = vsyncpa [#allocation4], 1 }
  0x29   :  { %132 = vsyncpa [#allocation5], 1 }

</bundles_post_ra>
